<compile_context>
chip_gen: v7x
topology: tpu7x:2x2x1
jax: 0.10.0
libtpu: 0.0.40
codegen_flags: <defaults>
</compile_context>

<pallas_src>
import functools

import jax
import jax.numpy as jnp
from jax.experimental import pallas as pl
from jax.experimental.pallas import tpu as pltpu


def _round_up(x, m):
    return ((x + m - 1) // m) * m


def _scoring_kernel(h_ref, r_ref, t_ref, w1h_ref, w1r_ref, w1t_ref,
                    b1_ref, w2t_ref, o_ref, *, compute_dtype):
    # --- Layer 1: three partial matmuls replace concat([h,r,t]) @ w1. ---
    def partial_dot(x_ref, w_ref):
        x = x_ref[...]
        if compute_dtype is not None and x.dtype != compute_dtype:
            x = x.astype(compute_dtype)          # cast in-kernel, not in HBM
        return jnp.dot(x, w_ref[...], preferred_element_type=jnp.float32)

    acc = partial_dot(h_ref, w1h_ref)
    acc = acc + partial_dot(r_ref, w1r_ref)
    acc = acc + partial_dot(t_ref, w1t_ref)
    hidden = jnp.maximum(acc + b1_ref[...], 0.0)          # (tile_b, H), f32

    # --- Layer 2, lane-dense: (1, H) x (tile_b, H)^T -> (1, tile_b). ---
    scores = jax.lax.dot_general(
        w2t_ref[...], hidden,
        dimension_numbers=(((1,), (1,)), ((), ())),
        preferred_element_type=jnp.float32,
    )
    o_ref[...] = scores.astype(o_ref.dtype)


@functools.partial(jax.jit, static_argnames=("tile_b", "compute_dtype"))
def custom_scoring_function(h, r, t, w1, b1, w2, b2, *,
                            tile_b=None, compute_dtype=None):
    """h, r, t: (B, E). w1: (3E, H), b1: (H,), w2: (H, 1), b2: (1,).

    compute_dtype=None keeps the stored (f32) dtype on the MXU; pass
    jnp.bfloat16 to opt into a lower-precision layer-1 matmul (f32 accum).
    Returns (B, 1) float32 scores.
    """
    B, E = h.shape
    H = w1.shape[1]
    assert w1.shape[0] == 3 * E

    if tile_b is None:
        target = 8192
        if B > 256:
            # Keep >= 2 grid steps so v7x megacore can shard the batch.
            target = min(target, _round_up(pl.cdiv(B, 2), 128))
        tile_b = max(128, min(target, _round_up(B, 128)))
    assert tile_b % 128 == 0

    grid = (pl.cdiv(B, tile_b),)          # ragged: last block may be partial

    # Split the first-layer weight so no (B, 3E) concat ever hits HBM.
    w_dtype = compute_dtype if compute_dtype is not None else w1.dtype
    w1h = w1[:E].astype(w_dtype)
    w1r = w1[E:2 * E].astype(w_dtype)
    w1t = w1[2 * E:].astype(w_dtype)

    b1_2d = b1.reshape(1, H).astype(jnp.float32)
    w2t = w2.reshape(1, H).astype(jnp.float32)      # (H, 1) -> (1, H)

    row_spec = pl.BlockSpec((tile_b, E), lambda i: (i, 0))
    w1_spec = pl.BlockSpec((E, H), lambda i: (0, 0))
    vec_spec = pl.BlockSpec((1, H), lambda i: (0, 0))

    # VMEM budget: 3 double-buffered input tiles (lanes padded to 128) plus
    # f32 hidden/acc temps; clamp to [32 MiB, 96 MiB] and stay < v7x's 64 MiB.
    in_itemsize = jnp.dtype(h.dtype).itemsize
    vmem_est = (3 * 2 * tile_b * _round_up(E, 128) * in_itemsize
                + 3 * tile_b * _round_up(H, 128) * 4
                + (2 << 20))
    vmem_limit = max(32 << 20, min(96 << 20, int(vmem_est)))

    kernel = functools.partial(_scoring_kernel, compute_dtype=compute_dtype)

    out = pl.pallas_call(
        kernel,
        out_shape=jax.ShapeDtypeStruct((1, B), jnp.float32),
        grid=grid,
        in_specs=[
            row_spec, row_spec, row_spec,        # h, r, t tiles (pipelined)
            w1_spec, w1_spec, w1_spec,           # w1 chunks (VMEM-resident)
            vec_spec,                            # b1 (resident)
            vec_spec,                            # w2^T (resident)
        ],
        out_specs=pl.BlockSpec((1, tile_b), lambda i: (0, i)),
        compiler_params=pltpu.CompilerParams(
            dimension_semantics=("parallel",),
            vmem_limit_bytes=vmem_limit,
        ),
    )(h, r, t, w1h, w1r, w1t, b1_2d, w2t)

    # Scalar output bias fused into the (cheap) host-side slice/reshape.
    return out[0].reshape(B, 1) + b2.astype(jnp.float32)


def _reference(h, r, t, w1, b1, w2, b2):
    x = jnp.concatenate([h, r, t], axis=-1)
    hid = jnp.maximum(
        jnp.dot(x, w1, precision=jax.lax.Precision.HIGHEST) + b1, 0.0)
    return jnp.dot(hid, w2, precision=jax.lax.Precision.HIGHEST) + b2


def _make_inputs(key, batch, embedding_dim, hidden_units):
    kh, kr, kt, kw1, kb1, kw2, kb2 = jax.random.split(key, 7)
    h = jax.random.normal(kh, (batch, embedding_dim), dtype=jnp.float32)
    r = jax.random.normal(kr, (batch, embedding_dim), dtype=jnp.float32)
    t = jax.random.normal(kt, (batch, embedding_dim), dtype=jnp.float32)
    fan_in1 = embedding_dim * 3
    w1 = jax.random.uniform(kw1, (fan_in1, hidden_units), jnp.float32,
                            -1.0 / jnp.sqrt(fan_in1), 1.0 / jnp.sqrt(fan_in1))
    b1 = jax.random.uniform(kb1, (hidden_units,), jnp.float32,
                            -1.0 / jnp.sqrt(fan_in1), 1.0 / jnp.sqrt(fan_in1))
    w2 = jax.random.uniform(kw2, (hidden_units, 1), jnp.float32,
                            -1.0 / jnp.sqrt(hidden_units),
                            1.0 / jnp.sqrt(hidden_units))
    b2 = jax.random.uniform(kb2, (1,), jnp.float32,
                            -1.0 / jnp.sqrt(hidden_units),
                            1.0 / jnp.sqrt(hidden_units))
    return h, r, t, w1, b1, w2, b2


if __name__ == "__main__":
    embedding_dim = 50
    hidden_units = 32

    key = jax.random.PRNGKey(0)
    k_small, k_ragged = jax.random.split(key)

    # --- Small batch (module-scale shapes). ---
    batch = 8
    h, r, t, w1, b1, w2, b2 = _make_inputs(k_small, batch,
                                           embedding_dim, hidden_units)
    ref = _reference(h, r, t, w1, b1, w2, b2)

    out_f32 = custom_scoring_function(h, r, t, w1, b1, w2, b2)
    out_f32 = jax.block_until_ready(out_f32)
    assert out_f32.shape == (batch, 1)
    assert jnp.allclose(out_f32, ref, atol=1e-4, rtol=1e-4)

    # Opt-in bf16 layer-1 path (cast happens inside the kernel body).
    out_bf16 = custom_scoring_function(h, r, t, w1, b1, w2, b2,
                                       compute_dtype=jnp.bfloat16)
    out_bf16 = jax.block_until_ready(out_bf16)
    assert out_bf16.shape == (batch, 1)
    assert jnp.allclose(out_bf16, ref, atol=2e-2, rtol=2e-2)

    # --- Ragged batch: exercises the multi-step grid + partial last block. ---
    batch_r = 333
    hr, rr, tr, w1r_, b1r_, w2r_, b2r_ = _make_inputs(
        k_ragged, batch_r, embedding_dim, hidden_units)
    ref_r = _reference(hr, rr, tr, w1r_, b1r_, w2r_, b2r_)
    out_r = custom_scoring_function(hr, rr, tr, w1r_, b1r_, w2r_, b2r_)
    out_r = jax.block_until_ready(out_r)
    assert out_r.shape == (batch_r, 1)
    assert jnp.allclose(out_r, ref_r, atol=1e-4, rtol=1e-4)

    print("KERNEL_OK")
</pallas_src>

<mosaic_0001>
module attributes {stable_mosaic.version = 11 : i64} {
  func.func @_scoring_kernel(%arg0: i32, %arg1: memref<128x50xf32, #tpu.memory_space<vmem>>, %arg2: memref<128x50xf32, #tpu.memory_space<vmem>>, %arg3: memref<128x50xf32, #tpu.memory_space<vmem>>, %arg4: memref<50x32xf32, #tpu.memory_space<vmem>>, %arg5: memref<50x32xf32, #tpu.memory_space<vmem>>, %arg6: memref<50x32xf32, #tpu.memory_space<vmem>>, %arg7: memref<1x32xf32, #tpu.memory_space<vmem>>, %arg8: memref<1x32xf32, #tpu.memory_space<vmem>>, %arg9: memref<1x128xf32, #tpu.memory_space<vmem>>) attributes {dimension_semantics = [#tpu.dimension_semantics<parallel>], iteration_bounds = array<i64: 1>, scalar_prefetch = 0 : i64, scratch_operands = 0 : i64, tpu.core_type = #tpu.core_type<tc>, window_params = [{transform_indices = @transform_0, window_bounds = array<i64: 128, 50>}, {transform_indices = @transform_1, window_bounds = array<i64: 128, 50>}, {transform_indices = @transform_2, window_bounds = array<i64: 128, 50>}, {pipeline_mode = #tpu.pipeline_mode<synchronous>, transform_indices = @transform_3, window_bounds = array<i64: 50, 32>}, {pipeline_mode = #tpu.pipeline_mode<synchronous>, transform_indices = @transform_4, window_bounds = array<i64: 50, 32>}, {pipeline_mode = #tpu.pipeline_mode<synchronous>, transform_indices = @transform_5, window_bounds = array<i64: 50, 32>}, {pipeline_mode = #tpu.pipeline_mode<synchronous>, transform_indices = @transform_6, window_bounds = array<i64: 1, 32>}, {pipeline_mode = #tpu.pipeline_mode<synchronous>, transform_indices = @transform_7, window_bounds = array<i64: 1, 32>}, {transform_indices = @transform_8, window_bounds = array<i64: 1, 128>}]} {
    %c0 = arith.constant 0 : index
    %c0_0 = arith.constant 0 : index
    %0 = vector.load %arg1[%c0, %c0_0] : memref<128x50xf32, #tpu.memory_space<vmem>>, vector<128x50xf32>
    %c0_1 = arith.constant 0 : index
    %c0_2 = arith.constant 0 : index
    %1 = vector.load %arg4[%c0_1, %c0_2] : memref<50x32xf32, #tpu.memory_space<vmem>>, vector<50x32xf32>
    %cst = arith.constant dense<0.000000e+00> : vector<128x32xf32>
    %2 = tpu.matmul %0, %1, %cst {dimension_numbers = #tpu.dot_dimension_numbers<[1], [0], [0], [1], [0, 0, 1, 1], [], []>} : vector<128x50xf32>, vector<50x32xf32>, vector<128x32xf32> -> vector<128x32xf32>
    %c0_3 = arith.constant 0 : index
    %c0_4 = arith.constant 0 : index
    %3 = vector.load %arg2[%c0_3, %c0_4] : memref<128x50xf32, #tpu.memory_space<vmem>>, vector<128x50xf32>
    %c0_5 = arith.constant 0 : index
    %c0_6 = arith.constant 0 : index
    %4 = vector.load %arg5[%c0_5, %c0_6] : memref<50x32xf32, #tpu.memory_space<vmem>>, vector<50x32xf32>
    %cst_7 = arith.constant dense<0.000000e+00> : vector<128x32xf32>
    %5 = tpu.matmul %3, %4, %cst_7 {dimension_numbers = #tpu.dot_dimension_numbers<[1], [0], [0], [1], [0, 0, 1, 1], [], []>} : vector<128x50xf32>, vector<50x32xf32>, vector<128x32xf32> -> vector<128x32xf32>
    %6 = arith.addf %2, %5 : vector<128x32xf32>
    %c0_8 = arith.constant 0 : index
    %c0_9 = arith.constant 0 : index
    %7 = vector.load %arg3[%c0_8, %c0_9] : memref<128x50xf32, #tpu.memory_space<vmem>>, vector<128x50xf32>
    %c0_10 = arith.constant 0 : index
    %c0_11 = arith.constant 0 : index
    %8 = vector.load %arg6[%c0_10, %c0_11] : memref<50x32xf32, #tpu.memory_space<vmem>>, vector<50x32xf32>
    %cst_12 = arith.constant dense<0.000000e+00> : vector<128x32xf32>
    %9 = tpu.matmul %7, %8, %cst_12 {dimension_numbers = #tpu.dot_dimension_numbers<[1], [0], [0], [1], [0, 0, 1, 1], [], []>} : vector<128x50xf32>, vector<50x32xf32>, vector<128x32xf32> -> vector<128x32xf32>
    %10 = arith.addf %6, %9 : vector<128x32xf32>
    %c0_13 = arith.constant 0 : index
    %c0_14 = arith.constant 0 : index
    %11 = vector.load %arg7[%c0_13, %c0_14] : memref<1x32xf32, #tpu.memory_space<vmem>>, vector<1x32xf32>
    %12 = vector.broadcast %11 : vector<1x32xf32> to vector<128x32xf32>
    %13 = arith.addf %10, %12 : vector<128x32xf32>
    %cst_15 = arith.constant 0.000000e+00 : f32
    %14 = vector.broadcast %cst_15 : f32 to vector<128x32xf32>
    %15 = arith.maximumf %13, %14 : vector<128x32xf32>
    %c0_16 = arith.constant 0 : index
    %c0_17 = arith.constant 0 : index
    %16 = vector.load %arg8[%c0_16, %c0_17] : memref<1x32xf32, #tpu.memory_space<vmem>>, vector<1x32xf32>
    %cst_18 = arith.constant dense<0.000000e+00> : vector<1x128xf32>
    %17 = tpu.matmul %16, %15, %cst_18 {dimension_numbers = #tpu.dot_dimension_numbers<[1], [1], [0], [0], [0, 0, 1, 0], [], []>} : vector<1x32xf32>, vector<128x32xf32>, vector<1x128xf32> -> vector<1x128xf32>
    %c0_19 = arith.constant 0 : index
    %c0_20 = arith.constant 0 : index
    %18 = vector.load %arg9[%c0_19, %c0_20] : memref<1x128xf32, #tpu.memory_space<vmem>>, vector<1x128xf32>
    tpu.vector_store %arg9[%c0_19, %c0_20], %17 {strides = array<i32>} : memref<1x128xf32, #tpu.memory_space<vmem>>, vector<1x128xf32>,
    return
  }
  func.func @transform_0(%arg0: i32) -> (i32, i32) {
    %c0_i32 = arith.constant 0 : i32
    %c0_i32_0 = arith.constant 0 : i32
    return %arg0, %c0_i32 : i32, i32
  }
  func.func @transform_1(%arg0: i32) -> (i32, i32) {
    %c0_i32 = arith.constant 0 : i32
    %c0_i32_0 = arith.constant 0 : i32
    return %arg0, %c0_i32 : i32, i32
  }
  func.func @transform_2(%arg0: i32) -> (i32, i32) {
    %c0_i32 = arith.constant 0 : i32
    %c0_i32_0 = arith.constant 0 : i32
    return %arg0, %c0_i32 : i32, i32
  }
  func.func @transform_3(%arg0: i32) -> (i32, i32) {
    %c0_i32 = arith.constant 0 : i32
    %c0_i32_0 = arith.constant 0 : i32
    %c0_i32_1 = arith.constant 0 : i32
    return %c0_i32, %c0_i32_0 : i32, i32
  }
  func.func @transform_4(%arg0: i32) -> (i32, i32) {
    %c0_i32 = arith.constant 0 : i32
    %c0_i32_0 = arith.constant 0 : i32
    %c0_i32_1 = arith.constant 0 : i32
    return %c0_i32, %c0_i32_0 : i32, i32
  }
  func.func @transform_5(%arg0: i32) -> (i32, i32) {
    %c0_i32 = arith.constant 0 : i32
    %c0_i32_0 = arith.constant 0 : i32
    %c0_i32_1 = arith.constant 0 : i32
    return %c0_i32, %c0_i32_0 : i32, i32
  }
  func.func @transform_6(%arg0: i32) -> (i32, i32) {
    %c0_i32 = arith.constant 0 : i32
    %c0_i32_0 = arith.constant 0 : i32
    %c0_i32_1 = arith.constant 0 : i32
    return %c0_i32, %c0_i32_0 : i32, i32
  }
  func.func @transform_7(%arg0: i32) -> (i32, i32) {
    %c0_i32 = arith.constant 0 : i32
    %c0_i32_0 = arith.constant 0 : i32
    %c0_i32_1 = arith.constant 0 : i32
    return %c0_i32, %c0_i32_0 : i32, i32
  }
  func.func @transform_8(%arg0: i32) -> (i32, i32) {
    %c0_i32 = arith.constant 0 : i32
    %c0_i32_0 = arith.constant 0 : i32
    return %c0_i32, %arg0 : i32, i32
  }
}

</mosaic_0001>

<bundles_post_ra>
// kernel: custom_scoring_function.1
= control target key start
LH: loop header
LB: loop body
LE: loop exit
PB: predicated region body
PF: predicated region fallthrough
CT: control target
= control target key end

     0   :  { %vm75_vm0 = vcmask 408576   ;;  %vm124_vm1 = vcmask 1041408   ;;  %vm1279_vm2 = vmmov 0   ;;  %vm744_vm3 = vcmask 261120   ;;  %s1651_s3 = inlined_call_operand.vmem [shape: f32[50,32], index: 3, kind: input, shape index: {}]   ;;  %s1652_s0 = inlined_call_operand.vmem [shape: f32[8,50], index: 0, kind: input, shape index: {}]   ;;  %s1653_s4 = inlined_call_operand.vmem [shape: f32[50,32], index: 4, kind: input, shape index: {}]   ;;  %s1654_s5 = inlined_call_operand.vmem [shape: f32[50,32], index: 5, kind: input, shape index: {}]   ;;  %s1655_s1 = inlined_call_operand.vmem [shape: f32[8,50], index: 1, kind: input, shape index: {}]   ;;  %s1656_s2 = inlined_call_operand.vmem [shape: f32[8,50], index: 2, kind: input, shape index: {}]   ;;  %s1657_s6 = inlined_call_operand.vmem [shape: f32[1,32], index: 6, kind: input, shape index: {}]   ;;  %s1658_s7 = inlined_call_operand.vmem [shape: f32[1,32], index: 7, kind: input, shape index: {}]   ;;  %s1659_s8 = inlined_call_operand.vmem [shape: f32[1,8], index: 8, kind: output, shape index: {}]  }
   0x1   :  { %v45_v0 = vld [vmem:[%s1651_s3] sm:$0xff]  ;;  %v46_v1 = vld [vmem:[%s1651_s3 + $0x8] sm:$0xff]  ;;  %v47_v2 = vld [vmem:[%s1651_s3 + $0x10] sm:$0xff] }
   0x2   :  { %v1187_v3 = vpack.c.bf16 %v46_v1, %v45_v0  ;;  %v48_v4 = vld [vmem:[%s1651_s3 + $0x18] sm:$0xff]  ;;  %v49_v6 = vld [vmem:[%s1651_s3 + $0x20] sm:$0xff]  ;;  %v50_v7 = vld [vmem:[%s1651_s3 + $0x28] sm:$0xff] }
   0x3   :  { %v1191_v5 = vpack.c.bf16 %v48_v4, %v47_v2  ;;  %v29_v8 = vld [vmem:[%s1652_s0] sm:$0xff]  ;;  %v1195_v9 = vpack.c.bf16 %v50_v7, %v49_v6  ;;  %v69_v11 = vld [vmem:[%s1653_s4 + $0x8] sm:$0xff]  ;;  %v70_v13 = vld [vmem:[%s1653_s4 + $0x10] sm:$0xff] }
   0x4   :  { %1188 = vmatprep.subr.bf16.mxu0 %v1187_v3  ;;  %1078 = vmatprep.mubr.msk.f32.mxu0 %vm75_vm0, %v29_v8  ;;  %v68_v10 = vld [vmem:[%s1653_s4] sm:$0xff]  ;;  %v71_v14 = vld [vmem:[%s1653_s4 + $0x18] sm:$0xff]  ;;  %v51_v15 = vld [vmem:[%s1651_s3 + $0x30] sm:$0x3] }
   0x5   :  { %1190 = vmatpush3.bf16.msra.mxu0 %v1187_v3  ;;  %v1175_v12 = vpack.c.bf16 %v69_v11, %v68_v10  ;;  %v485_v16 = vld [vmem:[%s1654_s5] sm:$0xff]  ;;  %v486_v17 = vld [vmem:[%s1654_s5 + $0x8] sm:$0xff]  ;;  %v1179_v18 = vpack.c.bf16 %v71_v14, %v70_v13  ;;  %v487_v19 = vld [vmem:[%s1654_s5 + $0x10] sm:$0xff]  ;;  %v1278_v14 = vmov 0.0|0.0  }
   0x6   :  { %1192 = vmatprep.subr.bf16.mxu0 %v1191_v5  ;;  %v488_v20 = vld [vmem:[%s1654_s5 + $0x18] sm:$0xff]  ;;  %v72_v21 = vld [vmem:[%s1653_s4 + $0x20] sm:$0xff]  ;;  %v73_v22 = vld [vmem:[%s1653_s4 + $0x28] sm:$0xff]  ;;  %v1199_v24 = vpack.c.bf16 %v486_v17, %v485_v16 }
   0x7   :  { %1176 = vmatprep.subr.bf16.mxu1 %v1175_v12  ;;  %v52_v23 = vld [vmem:[%s1655_s1] sm:$0xff]  ;;  %v30_v25 = vld [vmem:[%s1652_s0 + $0x8] sm:$0xff]  ;;  %v31_v26 = vld [vmem:[%s1652_s0 + $0x10] sm:$0xff]  ;;  %v1203_v27 = vpack.c.bf16 %v488_v20, %v487_v19  ;;  %v1183_v28 = vpack.c.bf16 %v73_v22, %v72_v21 }
   0x8   :  { %1178 = vmatpush3.bf16.msra.mxu1 %v1175_v12  ;;  %1040 = vmatprep.mubr.msk.f32.mxu1 %vm75_vm0, %v52_v23  ;;  %v489_v29 = vld [vmem:[%s1654_s5 + $0x20] sm:$0xff]  ;;  %v490_v30 = vld [vmem:[%s1654_s5 + $0x28] sm:$0xff]  ;;  %v32_v31 = vld [vmem:[%s1652_s0 + $0x18] sm:$0xff] }
   0x9   :  { %1194 = vmatpush3.bf16.msra.mxu0 %v1191_v5  ;;  %1180 = vmatprep.subr.bf16.mxu1 %v1179_v18  ;;  %v74_v32 = vld [vmem:[%s1653_s4 + $0x30] sm:$0x3]  ;;  %v33_v33 = vld [vmem:[%s1652_s0 + $0x20] sm:$0xff]  ;;  %v1207_v34 = vpack.c.bf16 %v490_v30, %v489_v29  ;;  %v34_v35 = vld [vmem:[%s1652_s0 + $0x28] sm:$0xff] }
   0xa   :  { %1196 = vmatprep.subr.bf16.mxu0 %v1195_v9  ;;  %v53_v36 = vld [vmem:[%s1655_s1 + $0x8] sm:$0xff]  ;;  %v35_v37 = vld [vmem:[%s1652_s0 + $0x30] sm:$0xff]  ;;  %v36_v40 = vld [vmem:[%s1652_s0 + $0x38] sm:$0xff] }
   0xb   :  { %v491_v38 = vld [vmem:[%s1654_s5 + $0x30] sm:$0x3]  ;;  %v55_v41 = vld [vmem:[%s1655_s1 + $0x18] sm:$0xff]  ;;  %v37_v42 = vld [vmem:[%s1652_s0 + $0x40] sm:$0xff] }
   0xc   :  { %1182 = vmatpush3.bf16.msra.mxu1 %v1179_v18  ;;  %v54_v39 = vld [vmem:[%s1655_s1 + $0x10] sm:$0xff]  ;;  %v56_v43 = vld [vmem:[%s1655_s1 + $0x20] sm:$0xff]  ;;  %v38_v44 = vld [vmem:[%s1652_s0 + $0x48] sm:$0xff] }
   0xd   :  { %1198 = vmatpush3.bf16.msra.mxu0 %v1195_v9  ;;  %1184 = vmatprep.subr.bf16.mxu1 %v1183_v28  ;;  %v57_v45 = vld [vmem:[%s1655_s1 + $0x28] sm:$0xff]  ;;  %v39_v46 = vld [vmem:[%s1652_s0 + $0x50] sm:$0xff]  ;;  %v40_v48 = vld [vmem:[%s1652_s0 + $0x58] sm:$0xff] }
   0xe   :  { %1076 = vmatprep.subr.msk.mxu0 %vm124_vm1, %v51_v15  ;;  %v58_v47 = vld [vmem:[%s1655_s1 + $0x30] sm:$0xff]  ;;  %v59_v49 = vld [vmem:[%s1655_s1 + $0x38] sm:$0xff]  ;;  %v41_v50 = vld [vmem:[%s1652_s0 + $0x60] sm:$0xff] }
   0xf   :  { %v60_v51 = vld [vmem:[%s1655_s1 + $0x40] sm:$0xff]  ;;  %v42_v52 = vld [vmem:[%s1652_s0 + $0x68] sm:$0xff]  ;;  %v43_v54 = vld [vmem:[%s1652_s0 + $0x70] sm:$0xff] }
  0x10   :  { %1186 = vmatpush3.bf16.msra.mxu1 %v1183_v28  ;;  %v61_v53 = vld [vmem:[%s1655_s1 + $0x48] sm:$0xff]  ;;  %v62_v55 = vld [vmem:[%s1655_s1 + $0x50] sm:$0xff]  ;;  %v44_v56 = vld [vmem:[%s1652_s0 + $0x78] sm:$0xff] }
  0x11   :  { %1077 = vmatpush3.msk.msra.mxu0 %vm124_vm1, %v51_v15  ;;  %1038 = vmatprep.subr.msk.mxu1 %vm124_vm1, %v74_v32  ;;  %v63_v57 = vld [vmem:[%s1655_s1 + $0x58] sm:$0xff]  ;;  %v469_v58 = vld [vmem:[%s1656_s2] sm:$0xff]  ;;  %v470_v60 = vld [vmem:[%s1656_s2 + $0x8] sm:$0xff]  ;;  %v1280_v15 = vmov 0.0  }
  0x12   :  { %1079 = vmatmul.mubr.msk.f32.vlgmr.msra.gmra.mrb[0].mxu0 %vm75_vm0, %v30_v25  ;;  %1200 = vmatprep.subr.bf16.mxu0 %v1199_v24  ;;  %v64_v59 = vld [vmem:[%s1655_s1 + $0x60] sm:$0xff]  ;;  %v65_v61 = vld [vmem:[%s1655_s1 + $0x68] sm:$0xff]  ;;  %v471_v62 = vld [vmem:[%s1656_s2 + $0x10] sm:$0xff] }
  0x13   :  { %1202 = vmatpush3.bf16.msra.mxu0 %v1199_v24  ;;  %1081 = vmatprep.mubr.msk.f32.mxu0 %vm75_vm0, %v31_v26  ;;  %v66_v63 = vld [vmem:[%s1655_s1 + $0x70] sm:$0xff]  ;;  %v472_v0 = vld [vmem:[%s1656_s2 + $0x18] sm:$0xff]  ;;  %v473_v2 = vld [vmem:[%s1656_s2 + $0x20] sm:$0xff] }
  0x14   :  { %1204 = vmatprep.subr.bf16.mxu0 %v1203_v27  ;;  %1039 = vmatpush3.msk.msra.mxu1 %vm124_vm1, %v74_v32  ;;  %v67_v1 = vld [vmem:[%s1655_s1 + $0x78] sm:$0xff]  ;;  %v474_v3 = vld [vmem:[%s1656_s2 + $0x28] sm:$0xff]  ;;  %v475_v4 = vld [vmem:[%s1656_s2 + $0x30] sm:$0xff] }
  0x15   :  { %1041 = vmatmul.mubr.msk.f32.vlgmr.msra.gmra.mrb[0].mxu1 %vm75_vm0, %v53_v36  ;;  %v476_v5 = vld [vmem:[%s1656_s2 + $0x38] sm:$0xff]  ;;  %v477_v6 = vld [vmem:[%s1656_s2 + $0x40] sm:$0xff]  ;;  %v478_v7 = vld [vmem:[%s1656_s2 + $0x48] sm:$0xff]  ;;  %1211 = vmatprep.subr.bf16.mxu1 %v1278_v14 }
  0x16   :  { %1082 = vmatmul.mubr.msk.f32.gmra.mrb[2].mxu0 %vm75_vm0, %v32_v31  ;;  %1043 = vmatprep.mubr.msk.f32.mxu1 %vm75_vm0, %v54_v39  ;;  %v479_v8 = vld [vmem:[%s1656_s2 + $0x50] sm:$0xff]  ;;  %v480_v9 = vld [vmem:[%s1656_s2 + $0x58] sm:$0xff]  ;;  %v481_v10 = vld [vmem:[%s1656_s2 + $0x60] sm:$0xff] }
  0x17   :  { %1084 = vmatprep.mubr.msk.f32.mxu0 %vm75_vm0, %v33_v33  ;;  %1206 = vmatpush3.bf16.msra.mxu0 %v1203_v27  ;;  %v482_v11 = vld [vmem:[%s1656_s2 + $0x68] sm:$0xff]  ;;  %v483_v12 = vld [vmem:[%s1656_s2 + $0x70] sm:$0xff]  ;;  %v484_v13 = vld [vmem:[%s1656_s2 + $0x78] sm:$0xff] }
  0x18   :  { %1208 = vmatprep.subr.bf16.mxu0 %v1207_v34  ;;  %v1591_v29 = vld [vmem:[%s1657_s6] ss:$0 sm:$0xff]  ;;  %vm1602_vm4 = vmpackc.low %vm744_vm3, %vm744_vm3 }
  0x19   :  { %1044 = vmatmul.mubr.msk.f32.gmra.mrb[2].mxu1 %vm75_vm0, %v55_v41 }
  0x1a   :  { %1085 = vmatmul.mubr.msk.f32.gmra.mrb[4].mxu0 %vm75_vm0, %v34_v35  ;;  %1046 = vmatprep.mubr.msk.f32.mxu1 %vm75_vm0, %v56_v43 }
  0x1b   :  { %1087 = vmatprep.mubr.msk.f32.mxu0 %vm75_vm0, %v35_v37  ;;  %1210 = vmatpush3.bf16.msra.mxu0 %v1207_v34 }
  0x1c   :  { %1114 = vmatprep.subr.msk.mxu0 %vm124_vm1, %v491_v38 }
  0x1d   :  { %1047 = vmatmul.mubr.msk.f32.gmra.mrb[4].mxu1 %vm75_vm0, %v57_v45 }
  0x1e   :  { %1088 = vmatmul.mubr.msk.f32.gmra.mrb[6].mxu0 %vm75_vm0, %v36_v40  ;;  %1049 = vmatprep.mubr.msk.f32.mxu1 %vm75_vm0, %v58_v47 }
  0x1f   :  { %1090 = vmatprep.mubr.msk.f32.mxu0 %vm75_vm0, %v37_v42  ;;  %1115 = vmatpush3.msk.msra.mxu0 %vm124_vm1, %v491_v38 }
  0x21   :  { %1050 = vmatmul.mubr.msk.f32.gmra.mrb[6].mxu1 %vm75_vm0, %v59_v49 }
  0x22   :  { %1091 = vmatmul.mubr.msk.f32.gmra.mrb[8].mxu0 %vm75_vm0, %v38_v44  ;;  %1052 = vmatprep.mubr.msk.f32.mxu1 %vm75_vm0, %v60_v51 }
  0x23   :  { %1093 = vmatprep.mubr.msk.f32.mxu0 %vm75_vm0, %v39_v46 }
  0x25   :  { %1053 = vmatmul.mubr.msk.f32.gmra.mrb[8].mxu1 %vm75_vm0, %v61_v53 }
  0x26   :  { %1094 = vmatmul.mubr.msk.f32.gmra.mrb[10].mxu0 %vm75_vm0, %v40_v48  ;;  %1055 = vmatprep.mubr.msk.f32.mxu1 %vm75_vm0, %v62_v55 }
  0x27   :  { %1096 = vmatprep.mubr.msk.f32.mxu0 %vm75_vm0, %v41_v50 }
  0x29   :  { %1056 = vmatmul.mubr.msk.f32.gmra.mrb[10].mxu1 %vm75_vm0, %v63_v57 }
  0x2a   :  { %1097 = vmatmul.mubr.msk.f32.gmra.mrb[12].mxu0 %vm75_vm0, %v42_v52  ;;  %1058 = vmatprep.mubr.msk.f32.mxu1 %vm75_vm0, %v64_v59 }
  0x2b   :  { %1099 = vmatprep.mubr.msk.f32.mxu0 %vm75_vm0, %v43_v54 }
  0x2d   :  { %1059 = vmatmul.mubr.msk.f32.gmra.mrb[12].mxu1 %vm75_vm0, %v65_v61 }
  0x2e   :  { %1100 = vmatmul.mubr.msk.f32.gmra.mrb[14].mxu0 %vm75_vm0, %v44_v56  ;;  %1061 = vmatprep.mubr.msk.f32.mxu1 %vm75_vm0, %v66_v63 }
  0x2f   :  { %1116 = vmatprep.mubr.msk.f32.mxu0 %vm75_vm0, %v469_v58 }
  0x31   :  { %1062 = vmatmul.mubr.msk.f32.gmra.mrb[14].mxu1 %vm75_vm0, %v67_v1 }
  0x32   :  { %1117 = vmatmul.mubr.msk.f32.vlgmr.msra.gmra.mrb[0].mxu0 %vm75_vm0, %v470_v60  ;;  %1172 = vmatprep.mubr.msk.f32.mxu1 %vm1279_vm2, %v1280_v15 }
  0x33   :  { %1119 = vmatprep.mubr.msk.f32.mxu0 %vm75_vm0, %v471_v62 }
  0x36   :  { %1120 = vmatmul.mubr.msk.f32.gmra.mrb[2].mxu0 %vm75_vm0, %v472_v0 }
  0x37   :  { %1122 = vmatprep.mubr.msk.f32.mxu0 %vm75_vm0, %v473_v2 }
  0x3a   :  { %1123 = vmatmul.mubr.msk.f32.gmra.mrb[4].mxu0 %vm75_vm0, %v474_v3 }
  0x3b   :  { %1125 = vmatprep.mubr.msk.f32.mxu0 %vm75_vm0, %v475_v4 }
  0x3e   :  { %1126 = vmatmul.mubr.msk.f32.gmra.mrb[6].mxu0 %vm75_vm0, %v476_v5 }
  0x3f   :  { %1128 = vmatprep.mubr.msk.f32.mxu0 %vm75_vm0, %v477_v6 }
  0x42   :  { %1129 = vmatmul.mubr.msk.f32.gmra.mrb[8].mxu0 %vm75_vm0, %v478_v7 }
  0x43   :  { %1131 = vmatprep.mubr.msk.f32.mxu0 %vm75_vm0, %v479_v8 }
  0x46   :  { %1132 = vmatmul.mubr.msk.f32.gmra.mrb[10].mxu0 %vm75_vm0, %v480_v9 }
  0x47   :  { %1134 = vmatprep.mubr.msk.f32.mxu0 %vm75_vm0, %v481_v10 }
  0x4a   :  { %1135 = vmatmul.mubr.msk.f32.gmra.mrb[12].mxu0 %vm75_vm0, %v482_v11 }
  0x4b   :  { %1137 = vmatprep.mubr.msk.f32.mxu0 %vm75_vm0, %v483_v12 }
  0x4e   :  { %1138 = vmatmul.mubr.msk.f32.gmra.mrb[14].mxu0 %vm75_vm0, %v484_v13 }
  0xe8   :  { %v1042_v16 = vpop.f32.mrb[0].mxu1 }
  0xe9   :  { %v194_v17 = vpop.f32.mrb[1].mxu1 }
  0xec   :  { %v1045_v18 = vpop.f32.mrb[2].mxu1 }
  0xed   :  { %v204_v19 = vpop.f32.mrb[3].mxu1 }
  0xf0   :  { %v1048_v20 = vpop.f32.mrb[4].mxu1 }
  0xf1   :  { %v214_v21 = vpop.f32.mrb[5].mxu1 }
  0xf4   :  { %v1051_v22 = vpop.f32.mrb[6].mxu1 }
  0xf5   :  { %v224_v23 = vpop.f32.mrb[7].mxu1 }
  0xf8   :  { %v1054_v24 = vpop.f32.mrb[8].mxu1 }
  0xf9   :  { %v234_v25 = vpop.f32.mrb[9].mxu1 }
  0xfc   :  { %v1057_v26 = vpop.f32.mrb[10].mxu1 }
  0xfd   :  { %v244_v27 = vpop.f32.mrb[11].mxu1 }
 0x100   :  { %v1060_v30 = vpop.f32.mrb[12].mxu1 }
 0x101   :  { %v254_v33 = vpop.f32.mrb[13].mxu1 }
 0x104   :  { %v1595_v38 = vpop.f32.mrb[14].mxu1 }
 0x105   :  { %v1118_v28 = vpop.f32.mrb[0].mxu0  ;;  %v1597_v42 = vpop.f32.mrb[15].mxu1 }
 0x106   :  { %v1243_v31 = vadd.f32 %v1118_v28, %v1042_v16  ;;  %v609_v32 = vpop.f32.mrb[1].mxu0 }
 0x107   :  { %v1244_v34 = vadd.f32 %v609_v32, %v194_v17 }
 0x108   :  { %v712_v35 = vadd.f32 %v1243_v31, %v1591_v29 }
 0x109   :  { %v711_v36 = vadd.f32 %v1244_v34, %v1591_v29  ;;  %v1121_v37 = vpop.f32.mrb[2].mxu0 }
 0x10a   :  { %v728_v39 = vmax.f32 %v712_v35, 0.0  ;;  %v1245_v40 = vadd.f32 %v1121_v37, %v1045_v18  ;;  %v619_v41 = vpop.f32.mrb[3].mxu0 }
 0x10b   :  { %v727_v43 = vmax.f32 %v711_v36, 0.0  ;;  %v1246_v44 = vadd.f32 %v619_v41, %v204_v19 }
 0x10c   :  { %v714_v45 = vadd.f32 %v1245_v40, %v1591_v29 }
 0x10d   :  { %v1212_v47 = vpack.c.bf16 %v728_v39, %v727_v43  ;;  %v713_v48 = vadd.f32 %v1246_v44, %v1591_v29  ;;  %v1124_v49 = vpop.f32.mrb[4].mxu0 }
 0x10e   :  { %v730_v50 = vmax.f32 %v714_v45, 0.0  ;;  %v1247_v51 = vadd.f32 %v1124_v49, %v1048_v20  ;;  %v629_v52 = vpop.f32.mrb[5].mxu0 }
 0x10f   :  { %v729_v53 = vmax.f32 %v713_v48, 0.0  ;;  %v1248_v54 = vadd.f32 %v629_v52, %v214_v21  ;;  %1214 = vmatpush3.bf16.xpose.msk.msra.mxu1 %vm1602_vm4, %v1212_v47 }
 0x110   :  { %v716_v55 = vadd.f32 %v1247_v51, %v1591_v29  ;;  %1215 = vmatprep.subr.bf16.mxu1 %v1278_v14 }
 0x111   :  { %v1216_v56 = vpack.c.bf16 %v730_v50, %v729_v53  ;;  %v715_v57 = vadd.f32 %v1248_v54, %v1591_v29  ;;  %v1127_v58 = vpop.f32.mrb[6].mxu0 }
 0x112   :  { %v732_v59 = vmax.f32 %v716_v55, 0.0  ;;  %v1249_v60 = vadd.f32 %v1127_v58, %v1051_v22  ;;  %v639_v61 = vpop.f32.mrb[7].mxu0 }
 0x113   :  { %v731_v62 = vmax.f32 %v715_v57, 0.0  ;;  %v1250_v63 = vadd.f32 %v639_v61, %v224_v23 }
 0x114   :  { %v718_v0 = vadd.f32 %v1249_v60, %v1591_v29 }
 0x115   :  { %v1220_v1 = vpack.c.bf16 %v732_v59, %v731_v62  ;;  %v717_v2 = vadd.f32 %v1250_v63, %v1591_v29  ;;  %v1130_v3 = vpop.f32.mrb[8].mxu0 }
 0x116   :  { %v734_v4 = vmax.f32 %v718_v0, 0.0  ;;  %v1251_v5 = vadd.f32 %v1130_v3, %v1054_v24  ;;  %v649_v6 = vpop.f32.mrb[9].mxu0 }
 0x117   :  { %v733_v7 = vmax.f32 %v717_v2, 0.0  ;;  %v1252_v8 = vadd.f32 %v649_v6, %v234_v25  ;;  %1218 = vmatpush3.bf16.xpose.msk.msra.mxu1 %vm1602_vm4, %v1216_v56 }
 0x118   :  { %v720_v9 = vadd.f32 %v1251_v5, %v1591_v29  ;;  %1219 = vmatprep.subr.bf16.mxu1 %v1278_v14 }
 0x119   :  { %v1224_v10 = vpack.c.bf16 %v734_v4, %v733_v7  ;;  %v719_v11 = vadd.f32 %v1252_v8, %v1591_v29  ;;  %v1133_v12 = vpop.f32.mrb[10].mxu0 }
 0x11a   :  { %v736_v13 = vmax.f32 %v720_v9, 0.0  ;;  %v1253_v15 = vadd.f32 %v1133_v12, %v1057_v26  ;;  %v659_v16 = vpop.f32.mrb[11].mxu0 }
 0x11b   :  { %v735_v17 = vmax.f32 %v719_v11, 0.0  ;;  %v1254_v18 = vadd.f32 %v659_v16, %v244_v27 }
 0x11c   :  { %v722_v19 = vadd.f32 %v1253_v15, %v1591_v29 }
 0x11d   :  { %v1228_v20 = vpack.c.bf16 %v736_v13, %v735_v17  ;;  %v721_v21 = vadd.f32 %v1254_v18, %v1591_v29  ;;  %v1136_v22 = vpop.f32.mrb[12].mxu0 }
 0x11e   :  { %v738_v23 = vmax.f32 %v722_v19, 0.0  ;;  %v1255_v24 = vadd.f32 %v1136_v22, %v1060_v30  ;;  %v669_v25 = vpop.f32.mrb[13].mxu0 }
 0x11f   :  { %v737_v28 = vmax.f32 %v721_v21, 0.0  ;;  %v1256_v31 = vadd.f32 %v669_v25, %v254_v33  ;;  %1222 = vmatpush3.bf16.xpose.msk.msra.mxu1 %vm1602_vm4, %v1220_v1 }
 0x120   :  { %v724_v32 = vadd.f32 %v1255_v24, %v1591_v29  ;;  %1223 = vmatprep.subr.bf16.mxu1 %v1278_v14 }
 0x121   :  { %v1232_v26 = vpack.c.bf16 %v738_v23, %v737_v28  ;;  %v723_v27 = vadd.f32 %v1256_v31, %v1591_v29  ;;  %v1139_v34 = vpop.f32.mrb[14].mxu0 }
 0x122   :  { %v740_v35 = vmax.f32 %v724_v32, 0.0  ;;  %v1257_v36 = vadd.f32 %v1139_v34, %v1595_v38  ;;  %v679_v37 = vpop.f32.mrb[15].mxu0 }
 0x123   :  { %v739_v39 = vmax.f32 %v723_v27, 0.0  ;;  %v1258_v30 = vadd.f32 %v679_v37, %v1597_v42 }
 0x124   :  { %v726_v33 = vadd.f32 %v1257_v36, %v1591_v29 }
 0x125   :  { %v1236_v40 = vpack.c.bf16 %v740_v35, %v739_v39  ;;  %v725_v41 = vadd.f32 %v1258_v30, %v1591_v29  ;;  %v743_v29 = vld [vmem:[%s1658_s7] sm:$0x1] }
 0x126   :  { %v742_v43 = vmax.f32 %v726_v33, 0.0 }
 0x127   :  { %v741_v44 = vmax.f32 %v725_v41, 0.0  ;;  %1226 = vmatpush3.bf16.xpose.msk.msra.mxu1 %vm1602_vm4, %v1224_v10 }
 0x128   :  { %1227 = vmatprep.subr.bf16.mxu1 %v1278_v14 }
 0x129   :  { %v1240_v45 = vpack.c.bf16 %v742_v43, %v741_v44 }
 0x12f   :  { %1230 = vmatpush3.bf16.xpose.msk.msra.mxu1 %vm1602_vm4, %v1228_v20 }
 0x130   :  { %1231 = vmatprep.subr.bf16.mxu1 %v1278_v14 }
 0x137   :  { %1234 = vmatpush3.bf16.xpose.msk.msra.mxu1 %vm1602_vm4, %v1232_v26 }
 0x138   :  { %1235 = vmatprep.subr.bf16.mxu1 %v1278_v14 }
 0x13f   :  { %1238 = vmatpush3.bf16.xpose.msk.msra.mxu1 %vm1602_vm4, %v1236_v40 }
 0x140   :  { %1239 = vmatprep.subr.bf16.mxu1 %v1278_v14 }
 0x147   :  { %1242 = vmatpush3.bf16.xpose.msk.msra.mxu1 %vm1602_vm4, %v1240_v45 }
 0x14e   :  { %1173 = vmatmul.mubr.msk.f32.vlgmr.msra.gmra.mrb[16].mxu1 %vm744_vm3, %v743_v29 }
 0x221   :  { %v862_v38 = vpop.f32.mrb[16].mxu1 }
 0x222   :  { %866 = vst [vmem:[%s1659_s8] sm:$0x1] %v862_v38  ;;  %v1174_v42 = vpop.f32.mrb[17].mxu1 }

</bundles_post_ra>
